<compile_context>
chip_gen: v5e
topology: v5e:2x2
jax: 0.10.0
libtpu: 0.0.40
codegen_flags: <defaults>
</compile_context>

<pallas_src>
import functools
import math

import jax
import jax.numpy as jnp
from jax.experimental import pallas as pl
from jax.experimental.pallas import tpu as pltpu

_TARGET_TILE_BYTES = 4 * 1024 * 1024   # ~4 MiB per x tile (HBM-roofline guidance)
_VMEM_LIMIT_BYTES = 48 * 1024 * 1024   # explicit scoped-VMEM budget, fits all gens


def _round_up(a, b):
    return (a + b - 1) // b * b


def _pick_row_tile(rows, sub, row_bytes, lane_tiles):
    """Sublane-aligned row tile targeting ~_TARGET_TILE_BYTES per x tile."""
    if rows <= sub:
        return rows                                   # full extent: always layout-legal
    tm = (_TARGET_TILE_BYTES // max(row_bytes, 1)) // sub * sub
    tm = max(sub, min(tm, 2048, _round_up(rows, sub)))
    # If the whole problem fits in one grid step, split rows so v7x's two
    # TensorCores both get work (no effect on v5e/v6e).
    if lane_tiles * pl.cdiv(rows, tm) < 2 and rows >= 2 * sub:
        tm = _round_up(pl.cdiv(rows, 2), sub)
    return tm


# ---------------------------------------------------------------------------
# Kernels
# ---------------------------------------------------------------------------

def _rowmask_kernel(x_ref, m_ref, o_ref):
    # x_ref: (TM, TL) tile of the (N*C, L) input; m_ref: (TM, 1) f32 scale.
    o_ref[...] = (x_ref[...].astype(jnp.float32) * m_ref[...]).astype(o_ref.dtype)


def _packed_kernel(x_ref, m_ref, o_ref, *, chan_len):
    # Lane-dense path: each row packs G = TL // chan_len whole channels.
    # m_ref is (TM, G); expand to (TM, TL) (each scale repeated chan_len times
    # along lanes) with a tiny one-hot matmul — MXU is idle in this DMA-bound
    # kernel, so the expansion is free.
    tl = x_ref.shape[-1]
    g = tl // chan_len
    lane = jax.lax.broadcasted_iota(jnp.int32, (g, tl), 1)
    grp = jax.lax.broadcasted_iota(jnp.int32, (g, tl), 0)
    lo = grp * chan_len
    onehot = ((lane >= lo) & (lane < lo + chan_len)).astype(jnp.float32)
    m_exp = jnp.dot(m_ref[...], onehot, preferred_element_type=jnp.float32)
    o_ref[...] = (x_ref[...].astype(jnp.float32) * m_exp).astype(o_ref.dtype)


# ---------------------------------------------------------------------------
# Wrapper
# ---------------------------------------------------------------------------

def spatial_dropout1d(x, *, p, key, training=True):
    """SpatialDropout1D on x of shape (N, C, L)."""
    if (not training) or p <= 0.0:
        return x
    if p >= 1.0:
        return jnp.zeros_like(x)   # torch Dropout3d with p=1 zeroes everything

    n, c, l = x.shape
    nc = n * c
    itemsize = jnp.dtype(x.dtype).itemsize
    sub = {4: 8, 2: 16, 1: 32}.get(itemsize, 8)

    # Per-channel keep/scale (tiny: N*C values), constant along L by construction.
    keep = jax.random.bernoulli(key, 1.0 - p, (nc,))
    scale = keep.astype(jnp.float32) * jnp.float32(1.0 / (1.0 - p))

    flops = 2 * nc * l
    bytes_accessed = 2 * nc * l * itemsize + nc * 4

    # ---- lane-dense packed path for small L --------------------------------
    if l < 128:
        base = (l * 128) // math.gcd(l, 128)           # lcm(L, 128)
        if nc % (base // l) == 0:
            row = base
            while row * 2 <= 2048 and nc % ((row * 2) // l) == 0:
                row *= 2                               # pack more channels per lane-row
            g = row // l
            r = nc // g
            x2 = x.reshape(r, row)                     # free reshape, no pad
            m2 = scale.reshape(r, g)
            tm = _pick_row_tile(r, sub, row * itemsize, 1)
            out2 = pl.pallas_call(
                functools.partial(_packed_kernel, chan_len=l),
                out_shape=jax.ShapeDtypeStruct((r, row), x.dtype),
                grid=(pl.cdiv(r, tm),),
                in_specs=[pl.BlockSpec((tm, row), lambda i: (i, 0)),
                          pl.BlockSpec((tm, g), lambda i: (i, 0))],
                out_specs=pl.BlockSpec((tm, row), lambda i: (i, 0)),
                compiler_params=pltpu.CompilerParams(
                    dimension_semantics=("parallel",),
                    vmem_limit_bytes=_VMEM_LIMIT_BYTES),
                cost_estimate=pl.CostEstimate(
                    flops=flops, transcendentals=0, bytes_accessed=bytes_accessed),
            )(x2, m2)
            return out2.reshape(n, c, l)

    # ---- general 2-D path (ragged edges handled by Pallas masking) ----------
    x2 = x.reshape(nc, l)
    m2 = scale.reshape(nc, 1)
    if l % 128 == 0:
        tl = min(l, 2048)
    elif l > 128:
        tl = min(l // 128 * 128, 2048)   # ragged lane edge: loads padded, stores masked
    else:
        # TODO(synk): small L that does not pack evenly; lane-sparse stores here.
        tl = l
    lane_tiles = pl.cdiv(l, tl)
    tm = _pick_row_tile(nc, sub, tl * itemsize, lane_tiles)

    out2 = pl.pallas_call(
        _rowmask_kernel,
        out_shape=jax.ShapeDtypeStruct((nc, l), x.dtype),
        grid=(pl.cdiv(nc, tm), lane_tiles),
        in_specs=[pl.BlockSpec((tm, tl), lambda i, j: (i, j)),
                  pl.BlockSpec((tm, 1), lambda i, j: (i, 0))],
        out_specs=pl.BlockSpec((tm, tl), lambda i, j: (i, j)),
        compiler_params=pltpu.CompilerParams(
            dimension_semantics=("parallel", "parallel"),
            vmem_limit_bytes=_VMEM_LIMIT_BYTES),
        cost_estimate=pl.CostEstimate(
            flops=flops, transcendentals=0, bytes_accessed=bytes_accessed),
    )(x2, m2)
    return out2.reshape(n, c, l)


# ---------------------------------------------------------------------------
# Self-test
# ---------------------------------------------------------------------------

if __name__ == "__main__":
    key = jax.random.PRNGKey(0)
    kx1, kd1, kx2, kd2 = jax.random.split(key, 4)
    p = 0.5

    def check(x, y):
        xh, yh = jax.device_get(x), jax.device_get(y)
        s = 1.0 / (1.0 - p)
        for ni in range(xh.shape[0]):
            for ci in range(xh.shape[1]):
                ch = yh[ni, ci]
                dropped = bool((ch == 0.0).all())
                kept = bool(abs(ch - xh[ni, ci] * s).max() < 1e-4)
                assert dropped or kept, (ni, ci)

    # Case 1: small L (=16) -> lane-dense packed path.
    x1 = jax.random.normal(kx1, (2, 4, 16), dtype=jnp.float32)
    y1 = jax.block_until_ready(spatial_dropout1d(x1, p=p, key=kd1, training=True))
    check(x1, y1)

    # Case 2: ragged L (=200, not a multiple of 128) -> general path, masked lane edge.
    x2 = jax.random.normal(kx2, (2, 8, 200), dtype=jnp.float32)
    y2 = jax.block_until_ready(spatial_dropout1d(x2, p=p, key=kd2, training=True))
    check(x2, y2)

    # Eval mode is identity.
    y_eval = jax.block_until_ready(spatial_dropout1d(x1, p=p, key=kd1, training=False))
    assert bool((jax.device_get(y_eval) == jax.device_get(x1)).all())

    print("KERNEL_OK")
</pallas_src>

<mosaic_0001>
module attributes {stable_mosaic.version = 11 : i64} {
  func.func @_packed_kernel(%arg0: i32, %arg1: memref<1x128xf32, #tpu.memory_space<vmem>>, %arg2: memref<1x8xf32, #tpu.memory_space<vmem>>, %arg3: memref<1x128xf32, #tpu.memory_space<vmem>>) attributes {dimension_semantics = [#tpu.dimension_semantics<parallel>], iteration_bounds = array<i64: 1>, scalar_prefetch = 0 : i64, scratch_operands = 0 : i64, tpu.core_type = #tpu.core_type<tc>, window_params = [{transform_indices = @transform_0, window_bounds = array<i64: 1, 128>}, {transform_indices = @transform_1, window_bounds = array<i64: 1, 8>}, {transform_indices = @transform_2, window_bounds = array<i64: 1, 128>}]} {
    %0 = tpu.iota {dimensions = array<i32: 1>} : vector<8x128xi32>
    %1 = tpu.iota {dimensions = array<i32: 0>} : vector<8x128xi32>
    %c16_i32 = arith.constant 16 : i32
    %2 = vector.broadcast %c16_i32 : i32 to vector<8x128xi32>
    %3 = arith.muli %1, %2 : vector<8x128xi32>
    %4 = arith.cmpi sge, %0, %3 : vector<8x128xi32>
    %c16_i32_0 = arith.constant 16 : i32
    %5 = vector.broadcast %c16_i32_0 : i32 to vector<8x128xi32>
    %6 = arith.addi %3, %5 : vector<8x128xi32>
    %7 = arith.cmpi slt, %0, %6 : vector<8x128xi32>
    %8 = arith.andi %4, %7 : vector<8x128xi1>
    %9 = arith.extui %8 : vector<8x128xi1> to vector<8x128xi32>
    %10 = arith.sitofp %9 : vector<8x128xi32> to vector<8x128xf32>
    %c0 = arith.constant 0 : index
    %c0_1 = arith.constant 0 : index
    %11 = vector.load %arg2[%c0, %c0_1] : memref<1x8xf32, #tpu.memory_space<vmem>>, vector<1x8xf32>
    %cst = arith.constant dense<0.000000e+00> : vector<1x128xf32>
    %12 = tpu.matmul %11, %10, %cst {dimension_numbers = #tpu.dot_dimension_numbers<[1], [0], [0], [1], [0, 0, 1, 1], [], []>} : vector<1x8xf32>, vector<8x128xf32>, vector<1x128xf32> -> vector<1x128xf32>
    %c0_2 = arith.constant 0 : index
    %c0_3 = arith.constant 0 : index
    %13 = vector.load %arg1[%c0_2, %c0_3] : memref<1x128xf32, #tpu.memory_space<vmem>>, vector<1x128xf32>
    %14 = arith.mulf %13, %12 : vector<1x128xf32>
    %c0_4 = arith.constant 0 : index
    %c0_5 = arith.constant 0 : index
    %15 = vector.load %arg3[%c0_4, %c0_5] : memref<1x128xf32, #tpu.memory_space<vmem>>, vector<1x128xf32>
    tpu.vector_store %arg3[%c0_4, %c0_5], %14 {strides = array<i32>} : memref<1x128xf32, #tpu.memory_space<vmem>>, vector<1x128xf32>,
    return
  }
  func.func @transform_0(%arg0: i32) -> (i32, i32) {
    %c0_i32 = arith.constant 0 : i32
    %c0_i32_0 = arith.constant 0 : i32
    return %arg0, %c0_i32 : i32, i32
  }
  func.func @transform_1(%arg0: i32) -> (i32, i32) {
    %c0_i32 = arith.constant 0 : i32
    %c0_i32_0 = arith.constant 0 : i32
    return %arg0, %c0_i32 : i32, i32
  }
  func.func @transform_2(%arg0: i32) -> (i32, i32) {
    %c0_i32 = arith.constant 0 : i32
    %c0_i32_0 = arith.constant 0 : i32
    return %arg0, %c0_i32 : i32, i32
  }
}

</mosaic_0001>

<bundles_post_ra>
// kernel: tpu_custom_call.1
= control target key start
LH: loop header
LB: loop body
LE: loop exit
PB: predicated region body
PF: predicated region fallthrough
CT: control target
= control target key end

     0   :  { %7 = vsyncpa [#allocation3], 0  ;;  %s210_s0 = inlined_call_operand.hbm [shape: f32[1,128], index: 0, kind: input, shape index: {}]   ;;  %s211_s1 = inlined_call_operand.hbm [shape: f32[1,8], index: 1, kind: input, shape index: {}]   ;;  %s212_s2 = inlined_call_operand.hbm [shape: f32[1,128], index: 2, kind: output, shape index: {}]  }
   0x1   :  { %8 = vsyncpa [#allocation6], 0 }
   0x2   :  { %9 = vsyncpa [#allocation4], 0  ;;  %s15_s11 = sshll.u32 %s210_s0, 4  ;;  %s182_s12 = smov [#allocation2]   ;;  %s16_s11 = int_to_ptr.hbm [resolvable:$true] %s15_s11 }
   0x3   :  { %s17_s13 = sshll.u32 %s182_s12, 4  ;;  %s26_s16 = sshll.u32 %s211_s1, 4  ;;  %s18_s13 = int_to_ptr.vmem [resolvable:$true] %s17_s13  ;;  %s27_s16 = int_to_ptr.hbm [resolvable:$true] %s26_s16 }
   0x4   :  { %20 = dma.hbm_to_vmem [thread:$0]  %s16_s11, 16, %s18_s13, [#allocation3]  }
   0x5   :  { %s183_s17 = smov [#allocation5]  }
   0x6   :  { %s28_s18 = sshll.u32 %s183_s17, 4  ;;  %s29_s18 = int_to_ptr.vmem [resolvable:$true] %s28_s18 }
   0x7   :  { %31 = dma.hbm_to_vmem [thread:$0]  %s27_s16, 16, %s29_s18, [#allocation6]  }
   0x8   :  { %176 = dma.done.wait [#allocation3], 16  }
   0x9   :  { %177 = vsyncadd [#allocation3], 4294967280 }
   0xa   :  { %178 = dma.done.wait [#allocation6], 16  }
   0xb   :  { %179 = vsyncadd [#allocation6], 4294967280  ;;  %v40_v0 = vlaneseq  ;;  %v51_v5 = vld [vmem:[#allocation5] sm:$0x1]  ;;  %vm52_vm2 = vcmask 64512   ;;  %v184_v6 = vmov 1.0  }
   0xc   :  { %v76_v7 = vld [vmem:[#allocation2] sm:$0x1]  ;;  %s185_s0 = smov [#allocation7]   ;;  %s86_s21 = sshll.u32 %s212_s2, 4  ;;  %s87_s21 = int_to_ptr.hbm [resolvable:$true] %s86_s21 }
   0xd   :  { %v41_v1 = vand.u32 127, %v40_v0  ;;  %v43_v2 = vshrl.u32 %v40_v0, 7  ;;  %s84_s1 = sshll.u32 %s185_s0, 4  ;;  %s85_s1 = int_to_ptr.vmem [resolvable:$true] %s84_s1 }
   0xf   :  { %v44_v3 = vmul.u32 16, %v43_v2 }
  0x11   :  { %vm45_vm0 = vcmp.ge.s32.totalorder %v41_v1, %v44_v3  ;;  %v46_v4 = vadd.s32 16, %v44_v3 }
  0x13   :  { %vm47_vm1 = vcmp.lt.s32.totalorder %v41_v1, %v46_v4 }
  0x14   :  { %vm48_vm3 = vmand %vm45_vm0, %vm47_vm1 }
  0x15   :  { %98 = vmatpush.msk.msra.mxu0 %vm48_vm3, %v184_v6 }
  0x16   :  { %99 = vmatmul.msk.f32.vlgmr.msra.gmra.mxu0 %vm52_vm2, %v51_v5 }
  0x93   :  { %v73_v8 = vpop.f32.mrf.mxu0 }
  0x94   :  { %v77_v9 = vmul.f32 %v76_v7, %v73_v8 }
  0x96   :  { %78 = vst [vmem:[#allocation7] sm:$0x1] %v77_v9 }
  0x97   :  { %89 = dma.vmem_to_hbm [thread:$0]  %s85_s1, 16, %s87_s21, [#allocation4]  }
  0x98   :  { %180 = dma.done.wait [#allocation4], 16  }
  0x99   :  { %181 = vsyncadd [#allocation4], 4294967280 }
  0x9a   :  { %94 = vsyncpa [#allocation3], 1 }
  0x9b   :  { %95 = vsyncpa [#allocation6], 1 }
  0x9c   :  { %96 = vsyncpa [#allocation4], 1 }

</bundles_post_ra>
